<compile_context>
chip_gen: v7x
topology: tpu7x:2x2x1
jax: 0.10.0
libtpu: 0.0.40
codegen_flags: <defaults>
</compile_context>

<pallas_src>
import functools
import math

import jax
import jax.numpy as jnp
from jax.experimental import pallas as pl
from jax.experimental.pallas import tpu as pltpu

_LANE = 128


def _cdiv(a: int, b: int) -> int:
    return -(-a // b)


def _round_up(a: int, b: int) -> int:
    return _cdiv(a, b) * b


def _vmem_capacity_bytes() -> int:
    try:
        return int(pltpu.get_tpu_info().vmem_capacity_bytes)
    except Exception:
        return 64 * 1024 * 1024  # conservative (v7x-sized) fallback


def _layernorm_kernel(alpha_ref, bias_ref, x_ref, o_ref, *, eps: float, n: int, k: int):
    """One block: (tile_rows, k*n).  Each physical row packs k logical rows of
    width n; mean/std are computed per logical row (segment)."""
    x = x_ref[...].astype(jnp.float32)
    alpha = alpha_ref[0]
    bias = bias_ref[0]
    inv_n = 1.0 / n
    inv_nm1 = 1.0 / (n - 1)

    def normalize(seg):
        # Fused single-pass moments in f32; var clamped >= 0 (E[x^2]-E[x]^2 form).
        s1 = jnp.sum(seg, axis=-1, keepdims=True)
        s2 = jnp.sum(seg * seg, axis=-1, keepdims=True)
        mean = s1 * inv_n
        var = jnp.maximum(s2 - n * (mean * mean), 0.0) * inv_nm1  # ddof=1, like torch.std
        denom = jnp.sqrt(var) + eps
        # EUP reciprocal (separate VLIW slot) + one Newton step -> f32 accuracy.
        inv = pl.reciprocal(denom, approx=True)
        inv = inv * (2.0 - denom * inv)
        scale = alpha * inv               # (rows, 1)
        shift = bias - mean * scale       # (rows, 1)
        return seg * scale + shift        # one FMA per element

    if k == 1:
        o_ref[...] = normalize(x).astype(o_ref.dtype)
    else:
        # Static unroll over the k packed segments (each n lanes wide).
        for i in range(k):
            lo = i * n
            o_ref[:, lo:lo + n] = normalize(x[:, lo:lo + n]).astype(o_ref.dtype)


def layer_normalization(x: jax.Array,
                        alpha: jax.Array,
                        bias: jax.Array,
                        eps: float = 1e-6) -> jax.Array:
    """Pallas TPU implementation of the scalar-affine LayerNormalization."""
    orig_shape = x.shape
    hidden = orig_shape[-1]
    if hidden < 2:
        raise ValueError("hidden must be >= 2 for the unbiased std (ddof=1).")

    rows = math.prod(orig_shape[:-1]) if len(orig_shape) > 1 else 1
    x2d = x.reshape(rows, hidden)

    # ---- small-hidden packing: k logical rows per 128-lane physical row -----
    k = 1
    if hidden < _LANE and _LANE % hidden == 0:
        kk = _LANE // hidden
        if 2 <= kk <= 16 and rows % kk == 0:
            k = kk
            x2d = x2d.reshape(rows // k, k * hidden)  # contiguous -> free reshape

    p_rows, p_hidden = x2d.shape  # block always covers the full last dim

    # ---- per-generation block sizing ----------------------------------------
    dtype_bytes = jnp.dtype(x.dtype).itemsize
    vmem_cap = _vmem_capacity_bytes()
    if vmem_cap >= 100 * 1024 * 1024:        # v5e / v6e (128 MiB VMEM)
        target_block_bytes = 8 * 1024 * 1024
        vmem_limit = 96 * 1024 * 1024
    else:                                    # v7x (64 MiB VMEM)
        target_block_bytes = 4 * 1024 * 1024
        vmem_limit = 48 * 1024 * 1024

    # sublane packing: 8 rows/vreg for f32, 16 for bf16, 32 for int8/fp8
    row_align = max(8, 32 // dtype_bytes)

    if p_rows <= row_align:
        tile_rows = p_rows                   # single full-extent block
    else:
        budget_rows = max(row_align,
                          target_block_bytes // max(1, p_hidden * dtype_bytes))
        budget_rows = (budget_rows // row_align) * row_align
        tile_rows = min(budget_rows, (p_rows // row_align) * row_align)
        # Ensure >= 2 grid steps when rows allow: lets the "parallel" axis shard
        # across v7x's two TensorCores (an extra step is ~free on 1-TC chips).
        if p_rows >= 2 * row_align:
            tile_rows = min(tile_rows, _round_up(_cdiv(p_rows, 2), row_align))
        tile_rows = max(tile_rows, row_align)

    # Ragged last block is fine: OOB reads only feed rows whose outputs are
    # dropped by Pallas.  Do NOT add cross-row reductions to the kernel.
    num_tiles = _cdiv(p_rows, tile_rows)

    alpha_s = jnp.asarray(alpha, jnp.float32).reshape(1)
    bias_s = jnp.asarray(bias, jnp.float32).reshape(1)

    kernel = functools.partial(_layernorm_kernel, eps=eps, n=hidden, k=k)

    cost = pl.CostEstimate(
        flops=int(8 * rows * hidden),
        transcendentals=int(2 * rows),
        bytes_accessed=int(2 * rows * hidden * dtype_bytes),
    )

    out2d = pl.pallas_call(
        kernel,
        out_shape=jax.ShapeDtypeStruct((p_rows, p_hidden), x.dtype),
        grid=(num_tiles,),
        in_specs=[
            pl.BlockSpec(memory_space=pltpu.SMEM),              # alpha (scalar)
            pl.BlockSpec(memory_space=pltpu.SMEM),              # bias  (scalar)
            pl.BlockSpec((tile_rows, p_hidden), lambda i: (i, 0)),
        ],
        out_specs=pl.BlockSpec((tile_rows, p_hidden), lambda i: (i, 0)),
        compiler_params=pltpu.CompilerParams(
            dimension_semantics=("parallel",),
            vmem_limit_bytes=vmem_limit,     # v5e default scoped limit is 16 MiB
        ),
        cost_estimate=cost,
    )(alpha_s, bias_s, x2d)

    # Free reshape back (no padding was ever introduced, so no slicing either).
    return out2d.reshape(orig_shape)


def _reference(x, alpha, bias, eps=1e-6):
    xf = x.astype(jnp.float32)
    mean = jnp.mean(xf, axis=-1, keepdims=True)
    std = jnp.std(xf, axis=-1, keepdims=True, ddof=1)  # unbiased, like torch
    return (alpha * (xf - mean) / (std + eps) + bias).astype(x.dtype)


if __name__ == "__main__":
    key = jax.random.PRNGKey(0)
    batch, seq, hidden = 2, 8, 32
    x = jax.random.normal(key, (batch, seq, hidden), dtype=jnp.float32)

    # deterministic parameter init, matching nn.Parameter(torch.ones(1)/zeros(1))
    alpha = jnp.ones((1,), jnp.float32)
    bias = jnp.zeros((1,), jnp.float32)

    out = layer_normalization(x, alpha, bias, eps=1e-6)
    out = jax.block_until_ready(out)

    ref = _reference(x, alpha, bias, eps=1e-6)
    assert out.shape == x.shape and out.dtype == x.dtype
    assert jnp.allclose(out, ref, atol=1e-5, rtol=1e-5), "mismatch vs reference"

    print("KERNEL_OK")
</pallas_src>

<mosaic_0001>
module attributes {stable_mosaic.version = 11 : i64} {
  func.func @_layernorm_kernel(%arg0: i32, %arg1: memref<1xf32, #tpu.memory_space<smem>>, %arg2: memref<1xf32, #tpu.memory_space<smem>>, %arg3: memref<4x128xf32, #tpu.memory_space<vmem>>, %arg4: memref<4x128xf32, #tpu.memory_space<vmem>>) attributes {dimension_semantics = [#tpu.dimension_semantics<parallel>], iteration_bounds = array<i64: 1>, scalar_prefetch = 0 : i64, scratch_operands = 0 : i64, tpu.core_type = #tpu.core_type<tc>, window_params = [{transform_indices = @transform_0, window_bounds = array<i64: 1>}, {transform_indices = @transform_1, window_bounds = array<i64: 1>}, {transform_indices = @transform_2, window_bounds = array<i64: 4, 128>}, {transform_indices = @transform_3, window_bounds = array<i64: 4, 128>}]} {
    %c0 = arith.constant 0 : index
    %c0_0 = arith.constant 0 : index
    %0 = vector.load %arg3[%c0, %c0_0] : memref<4x128xf32, #tpu.memory_space<vmem>>, vector<4x128xf32>
    %c0_1 = arith.constant 0 : index
    %1 = memref.load %arg1[%c0_1] : memref<1xf32, #tpu.memory_space<smem>>
    %c0_2 = arith.constant 0 : index
    %2 = memref.load %arg2[%c0_2] : memref<1xf32, #tpu.memory_space<smem>>
    %3 = vector.extract_strided_slice %0 {offsets = [0, 0], sizes = [4, 32], strides = [1, 1]} : vector<4x128xf32> to vector<4x32xf32>
    %cst = arith.constant dense<0.000000e+00> : vector<4xf32>
    %4 = vector.multi_reduction <add>, %3, %cst [1] : vector<4x32xf32> to vector<4xf32>
    %5 = vector.shape_cast %4 : vector<4xf32> to vector<4x1xf32>
    %6 = arith.mulf %3, %3 : vector<4x32xf32>
    %cst_3 = arith.constant dense<0.000000e+00> : vector<4xf32>
    %7 = vector.multi_reduction <add>, %6, %cst_3 [1] : vector<4x32xf32> to vector<4xf32>
    %8 = vector.shape_cast %7 : vector<4xf32> to vector<4x1xf32>
    %cst_4 = arith.constant 3.125000e-02 : f32
    %9 = vector.broadcast %cst_4 : f32 to vector<4x1xf32>
    %10 = arith.mulf %5, %9 : vector<4x1xf32>
    %11 = arith.mulf %10, %10 : vector<4x1xf32>
    %cst_5 = arith.constant 3.200000e+01 : f32
    %12 = vector.broadcast %cst_5 : f32 to vector<4x1xf32>
    %13 = arith.mulf %12, %11 : vector<4x1xf32>
    %14 = arith.subf %8, %13 : vector<4x1xf32>
    %cst_6 = arith.constant 0.000000e+00 : f32
    %15 = vector.broadcast %cst_6 : f32 to vector<4x1xf32>
    %16 = arith.maximumf %14, %15 : vector<4x1xf32>
    %cst_7 = arith.constant 0.0322580636 : f32
    %17 = vector.broadcast %cst_7 : f32 to vector<4x1xf32>
    %18 = arith.mulf %16, %17 : vector<4x1xf32>
    %19 = math.sqrt %18 : vector<4x1xf32>
    %cst_8 = arith.constant 9.99999997E-7 : f32
    %20 = vector.broadcast %cst_8 : f32 to vector<4x1xf32>
    %21 = arith.addf %19, %20 : vector<4x1xf32>
    %22 = tpu.reciprocal %21 {approx = true} : vector<4x1xf32> -> vector<4x1xf32>
    %23 = arith.mulf %21, %22 : vector<4x1xf32>
    %cst_9 = arith.constant 2.000000e+00 : f32
    %24 = vector.broadcast %cst_9 : f32 to vector<4x1xf32>
    %25 = arith.subf %24, %23 : vector<4x1xf32>
    %26 = arith.mulf %22, %25 : vector<4x1xf32>
    %27 = vector.broadcast %1 : f32 to vector<4x1xf32>
    %28 = arith.mulf %27, %26 : vector<4x1xf32>
    %29 = arith.mulf %10, %28 : vector<4x1xf32>
    %30 = vector.broadcast %2 : f32 to vector<4x1xf32>
    %31 = arith.subf %30, %29 : vector<4x1xf32>
    %32 = vector.broadcast %28 : vector<4x1xf32> to vector<4x32xf32>
    %33 = arith.mulf %3, %32 : vector<4x32xf32>
    %34 = vector.broadcast %31 : vector<4x1xf32> to vector<4x32xf32>
    %35 = arith.addf %33, %34 : vector<4x32xf32>
    %c0_10 = arith.constant 0 : index
    %c0_11 = arith.constant 0 : index
    %36 = vector.load %arg4[%c0_10, %c0_11] : memref<4x128xf32, #tpu.memory_space<vmem>>, vector<4x32xf32>
    tpu.vector_store %arg4[%c0_10, %c0_11], %35 {strides = array<i32>} : memref<4x128xf32, #tpu.memory_space<vmem>>, vector<4x32xf32>,
    %37 = vector.extract_strided_slice %0 {offsets = [0, 32], sizes = [4, 32], strides = [1, 1]} : vector<4x128xf32> to vector<4x32xf32>
    %cst_12 = arith.constant dense<0.000000e+00> : vector<4xf32>
    %38 = vector.multi_reduction <add>, %37, %cst_12 [1] : vector<4x32xf32> to vector<4xf32>
    %39 = vector.shape_cast %38 : vector<4xf32> to vector<4x1xf32>
    %40 = arith.mulf %37, %37 : vector<4x32xf32>
    %cst_13 = arith.constant dense<0.000000e+00> : vector<4xf32>
    %41 = vector.multi_reduction <add>, %40, %cst_13 [1] : vector<4x32xf32> to vector<4xf32>
    %42 = vector.shape_cast %41 : vector<4xf32> to vector<4x1xf32>
    %cst_14 = arith.constant 3.125000e-02 : f32
    %43 = vector.broadcast %cst_14 : f32 to vector<4x1xf32>
    %44 = arith.mulf %39, %43 : vector<4x1xf32>
    %45 = arith.mulf %44, %44 : vector<4x1xf32>
    %cst_15 = arith.constant 3.200000e+01 : f32
    %46 = vector.broadcast %cst_15 : f32 to vector<4x1xf32>
    %47 = arith.mulf %46, %45 : vector<4x1xf32>
    %48 = arith.subf %42, %47 : vector<4x1xf32>
    %cst_16 = arith.constant 0.000000e+00 : f32
    %49 = vector.broadcast %cst_16 : f32 to vector<4x1xf32>
    %50 = arith.maximumf %48, %49 : vector<4x1xf32>
    %cst_17 = arith.constant 0.0322580636 : f32
    %51 = vector.broadcast %cst_17 : f32 to vector<4x1xf32>
    %52 = arith.mulf %50, %51 : vector<4x1xf32>
    %53 = math.sqrt %52 : vector<4x1xf32>
    %cst_18 = arith.constant 9.99999997E-7 : f32
    %54 = vector.broadcast %cst_18 : f32 to vector<4x1xf32>
    %55 = arith.addf %53, %54 : vector<4x1xf32>
    %56 = tpu.reciprocal %55 {approx = true} : vector<4x1xf32> -> vector<4x1xf32>
    %57 = arith.mulf %55, %56 : vector<4x1xf32>
    %cst_19 = arith.constant 2.000000e+00 : f32
    %58 = vector.broadcast %cst_19 : f32 to vector<4x1xf32>
    %59 = arith.subf %58, %57 : vector<4x1xf32>
    %60 = arith.mulf %56, %59 : vector<4x1xf32>
    %61 = vector.broadcast %1 : f32 to vector<4x1xf32>
    %62 = arith.mulf %61, %60 : vector<4x1xf32>
    %63 = arith.mulf %44, %62 : vector<4x1xf32>
    %64 = vector.broadcast %2 : f32 to vector<4x1xf32>
    %65 = arith.subf %64, %63 : vector<4x1xf32>
    %66 = vector.broadcast %62 : vector<4x1xf32> to vector<4x32xf32>
    %67 = arith.mulf %37, %66 : vector<4x32xf32>
    %68 = vector.broadcast %65 : vector<4x1xf32> to vector<4x32xf32>
    %69 = arith.addf %67, %68 : vector<4x32xf32>
    %c0_20 = arith.constant 0 : index
    %c32 = arith.constant 32 : index
    %70 = vector.load %arg4[%c0_20, %c32] : memref<4x128xf32, #tpu.memory_space<vmem>>, vector<4x32xf32>
    tpu.vector_store %arg4[%c0_20, %c32], %69 {strides = array<i32>} : memref<4x128xf32, #tpu.memory_space<vmem>>, vector<4x32xf32>,
    %71 = vector.extract_strided_slice %0 {offsets = [0, 64], sizes = [4, 32], strides = [1, 1]} : vector<4x128xf32> to vector<4x32xf32>
    %cst_21 = arith.constant dense<0.000000e+00> : vector<4xf32>
    %72 = vector.multi_reduction <add>, %71, %cst_21 [1] : vector<4x32xf32> to vector<4xf32>
    %73 = vector.shape_cast %72 : vector<4xf32> to vector<4x1xf32>
    %74 = arith.mulf %71, %71 : vector<4x32xf32>
    %cst_22 = arith.constant dense<0.000000e+00> : vector<4xf32>
    %75 = vector.multi_reduction <add>, %74, %cst_22 [1] : vector<4x32xf32> to vector<4xf32>
    %76 = vector.shape_cast %75 : vector<4xf32> to vector<4x1xf32>
    %cst_23 = arith.constant 3.125000e-02 : f32
    %77 = vector.broadcast %cst_23 : f32 to vector<4x1xf32>
    %78 = arith.mulf %73, %77 : vector<4x1xf32>
    %79 = arith.mulf %78, %78 : vector<4x1xf32>
    %cst_24 = arith.constant 3.200000e+01 : f32
    %80 = vector.broadcast %cst_24 : f32 to vector<4x1xf32>
    %81 = arith.mulf %80, %79 : vector<4x1xf32>
    %82 = arith.subf %76, %81 : vector<4x1xf32>
    %cst_25 = arith.constant 0.000000e+00 : f32
    %83 = vector.broadcast %cst_25 : f32 to vector<4x1xf32>
    %84 = arith.maximumf %82, %83 : vector<4x1xf32>
    %cst_26 = arith.constant 0.0322580636 : f32
    %85 = vector.broadcast %cst_26 : f32 to vector<4x1xf32>
    %86 = arith.mulf %84, %85 : vector<4x1xf32>
    %87 = math.sqrt %86 : vector<4x1xf32>
    %cst_27 = arith.constant 9.99999997E-7 : f32
    %88 = vector.broadcast %cst_27 : f32 to vector<4x1xf32>
    %89 = arith.addf %87, %88 : vector<4x1xf32>
    %90 = tpu.reciprocal %89 {approx = true} : vector<4x1xf32> -> vector<4x1xf32>
    %91 = arith.mulf %89, %90 : vector<4x1xf32>
    %cst_28 = arith.constant 2.000000e+00 : f32
    %92 = vector.broadcast %cst_28 : f32 to vector<4x1xf32>
    %93 = arith.subf %92, %91 : vector<4x1xf32>
    %94 = arith.mulf %90, %93 : vector<4x1xf32>
    %95 = vector.broadcast %1 : f32 to vector<4x1xf32>
    %96 = arith.mulf %95, %94 : vector<4x1xf32>
    %97 = arith.mulf %78, %96 : vector<4x1xf32>
    %98 = vector.broadcast %2 : f32 to vector<4x1xf32>
    %99 = arith.subf %98, %97 : vector<4x1xf32>
    %100 = vector.broadcast %96 : vector<4x1xf32> to vector<4x32xf32>
    %101 = arith.mulf %71, %100 : vector<4x32xf32>
    %102 = vector.broadcast %99 : vector<4x1xf32> to vector<4x32xf32>
    %103 = arith.addf %101, %102 : vector<4x32xf32>
    %c0_29 = arith.constant 0 : index
    %c64 = arith.constant 64 : index
    %104 = vector.load %arg4[%c0_29, %c64] : memref<4x128xf32, #tpu.memory_space<vmem>>, vector<4x32xf32>
    tpu.vector_store %arg4[%c0_29, %c64], %103 {strides = array<i32>} : memref<4x128xf32, #tpu.memory_space<vmem>>, vector<4x32xf32>,
    %105 = vector.extract_strided_slice %0 {offsets = [0, 96], sizes = [4, 32], strides = [1, 1]} : vector<4x128xf32> to vector<4x32xf32>
    %cst_30 = arith.constant dense<0.000000e+00> : vector<4xf32>
    %106 = vector.multi_reduction <add>, %105, %cst_30 [1] : vector<4x32xf32> to vector<4xf32>
    %107 = vector.shape_cast %106 : vector<4xf32> to vector<4x1xf32>
    %108 = arith.mulf %105, %105 : vector<4x32xf32>
    %cst_31 = arith.constant dense<0.000000e+00> : vector<4xf32>
    %109 = vector.multi_reduction <add>, %108, %cst_31 [1] : vector<4x32xf32> to vector<4xf32>
    %110 = vector.shape_cast %109 : vector<4xf32> to vector<4x1xf32>
    %cst_32 = arith.constant 3.125000e-02 : f32
    %111 = vector.broadcast %cst_32 : f32 to vector<4x1xf32>
    %112 = arith.mulf %107, %111 : vector<4x1xf32>
    %113 = arith.mulf %112, %112 : vector<4x1xf32>
    %cst_33 = arith.constant 3.200000e+01 : f32
    %114 = vector.broadcast %cst_33 : f32 to vector<4x1xf32>
    %115 = arith.mulf %114, %113 : vector<4x1xf32>
    %116 = arith.subf %110, %115 : vector<4x1xf32>
    %cst_34 = arith.constant 0.000000e+00 : f32
    %117 = vector.broadcast %cst_34 : f32 to vector<4x1xf32>
    %118 = arith.maximumf %116, %117 : vector<4x1xf32>
    %cst_35 = arith.constant 0.0322580636 : f32
    %119 = vector.broadcast %cst_35 : f32 to vector<4x1xf32>
    %120 = arith.mulf %118, %119 : vector<4x1xf32>
    %121 = math.sqrt %120 : vector<4x1xf32>
    %cst_36 = arith.constant 9.99999997E-7 : f32
    %122 = vector.broadcast %cst_36 : f32 to vector<4x1xf32>
    %123 = arith.addf %121, %122 : vector<4x1xf32>
    %124 = tpu.reciprocal %123 {approx = true} : vector<4x1xf32> -> vector<4x1xf32>
    %125 = arith.mulf %123, %124 : vector<4x1xf32>
    %cst_37 = arith.constant 2.000000e+00 : f32
    %126 = vector.broadcast %cst_37 : f32 to vector<4x1xf32>
    %127 = arith.subf %126, %125 : vector<4x1xf32>
    %128 = arith.mulf %124, %127 : vector<4x1xf32>
    %129 = vector.broadcast %1 : f32 to vector<4x1xf32>
    %130 = arith.mulf %129, %128 : vector<4x1xf32>
    %131 = arith.mulf %112, %130 : vector<4x1xf32>
    %132 = vector.broadcast %2 : f32 to vector<4x1xf32>
    %133 = arith.subf %132, %131 : vector<4x1xf32>
    %134 = vector.broadcast %130 : vector<4x1xf32> to vector<4x32xf32>
    %135 = arith.mulf %105, %134 : vector<4x32xf32>
    %136 = vector.broadcast %133 : vector<4x1xf32> to vector<4x32xf32>
    %137 = arith.addf %135, %136 : vector<4x32xf32>
    %c0_38 = arith.constant 0 : index
    %c96 = arith.constant 96 : index
    %138 = vector.load %arg4[%c0_38, %c96] : memref<4x128xf32, #tpu.memory_space<vmem>>, vector<4x32xf32>
    tpu.vector_store %arg4[%c0_38, %c96], %137 {strides = array<i32>} : memref<4x128xf32, #tpu.memory_space<vmem>>, vector<4x32xf32>,
    return
  }
  func.func @transform_0(%arg0: i32) -> i32 {
    %c0_i32 = arith.constant 0 : i32
    %c0_i32_0 = arith.constant 0 : i32
    return %c0_i32 : i32
  }
  func.func @transform_1(%arg0: i32) -> i32 {
    %c0_i32 = arith.constant 0 : i32
    %c0_i32_0 = arith.constant 0 : i32
    return %c0_i32 : i32
  }
  func.func @transform_2(%arg0: i32) -> (i32, i32) {
    %c0_i32 = arith.constant 0 : i32
    %c0_i32_0 = arith.constant 0 : i32
    return %arg0, %c0_i32 : i32, i32
  }
  func.func @transform_3(%arg0: i32) -> (i32, i32) {
    %c0_i32 = arith.constant 0 : i32
    %c0_i32_0 = arith.constant 0 : i32
    return %arg0, %c0_i32 : i32, i32
  }
}

</mosaic_0001>

<bundles_post_ra>
// kernel: tpu_custom_call.1
= control target key start
LH: loop header
LB: loop body
LE: loop exit
PB: predicated region body
PF: predicated region fallthrough
CT: control target
= control target key end

     0   :  { %s225_s14 = smov 96   ;;  %s226_s15 = smov 32   ;;  %s313_s0 = inlined_call_operand.<no memory space> [shape: f32[1], index: 0, kind: input, shape index: {}]   ;;  %s314_s1 = inlined_call_operand.<no memory space> [shape: f32[1], index: 1, kind: input, shape index: {}]   ;;  %s315_s2 = inlined_call_operand.vmem [shape: f32[4,128], index: 2, kind: input, shape index: {}]   ;;  %s316_s3 = inlined_call_operand.hbm [shape: f32[4,128], index: 3, kind: output, shape index: {}]  }
   0x1   :  { %v252_v0 = vld [vmem:[%s315_s2] sm:$0xf] }
   0x2   :  { %55 = vrot.lane.b32.xlu0 %v252_v0, %s225_s14  ;;  %130 = vrot.lane.b32.xlu1 %v252_v0, %s226_s15  ;;  %v24_v1 = vmul.f32 %v252_v0, %v252_v0 }
   0x3   :  { %10 = vsyncpa [#allocation5], 0  ;;  %s227_s16 = smov 64   ;;  %vm20_vm0 = vcmask 257024   ;;  %v271_v33 = vstv %s313_s0  ;;  %v277_v36 = vstv %s314_s1  ;;  %vm91_vm9 = vcmask 519424   ;;  %s228_s0 = smov [#allocation4]  }
   0x4   :  { %v21_v2 = vsel %vm20_vm0, %v252_v0, 0.0  ;;  %v25_v3 = vsel %vm20_vm0, %v24_v1, 0.0  ;;  %vm128_vm10 = vcmask 781824   ;;  %s173_s1 = sshll.u32 %s228_s0, 4  ;;  %vm165_vm11 = vcmask 1044224   ;;  %s174_s1 = int_to_ptr.vmem [resolvable:$true] %s173_s1 }
   0x5   :  { %s201_s20 = scalar_lea.vmem %s174_s1, 64  ;;  %p206_p1 = scmp.lt.s32.totalorder %s174_s1, %s174_s1 }
   0x6   :  { %93 = vrot.lane.b32.xlu0 %v252_v0, %s227_s16  ;;  %62 = vrot.lane.b32.xlu1 %v24_v1, %s225_s14  ;;  %p202_p0 = scmp.ne.s32.totalorder %s174_s1, %s201_s20  ;;  %p207_p2 = scmp.lt.s32.totalorder %s201_s20, %s201_s20 }
   0x8   :  { %p208_p3 = por %p207_p2, %p206_p1 }
   0xa   :  { %99 = vrot.lane.b32.xlu0 %v24_v1, %s227_s16  ;;  %136 = vrot.lane.b32.xlu1 %v24_v1, %s226_s15  ;;  %p209_p4 = pnand %p208_p3, %p202_p0 }
  0x29   :  { %22 = vadd.xlane.f32.xlu0 %v21_v2 }
  0x2e   :  { %26 = vadd.xlane.f32.xlu1 %v25_v3 }
  0x74   :  { %v56_v4 = vpop.permute.xlu0 %55  ;;  %v131_v5 = vpop.permute.xlu1 %130 }
  0x75   :  { %v58_v6 = vsel %vm20_vm0, %v56_v4, 0.0  ;;  %v133_v13 = vsel %vm20_vm0, %v131_v5, 0.0 }
  0x76   :  { %59 = vadd.xlane.f32.xlu0 %v58_v6 }
  0x78   :  { %v94_v7 = vpop.permute.xlu0 %93  ;;  %v63_v8 = vpop.permute.xlu1 %62 }
  0x79   :  { %v96_v9 = vsel %vm20_vm0, %v94_v7, 0.0  ;;  %v65_v10 = vsel %vm20_vm0, %v63_v8, 0.0 }
  0x7a   :  { %97 = vadd.xlane.f32.xlu1 %v96_v9  ;;  %66 = vadd.xlane.f32.xlu0 %v65_v10 }
  0x7c   :  { %v100_v11 = vpop.permute.xlu0 %99  ;;  %v137_v12 = vpop.permute.xlu1 %136 }
  0x7d   :  { %v102_v14 = vsel %vm20_vm0, %v100_v11, 0.0  ;;  %v139_v15 = vsel %vm20_vm0, %v137_v12, 0.0 }
  0x7e   :  { %134 = vadd.xlane.f32.xlu1 %v133_v13  ;;  %103 = vadd.xlane.f32.xlu0 %v102_v14 }
  0x82   :  { %140 = vadd.xlane.f32.xlu0 %v139_v15 }
  0xb6   :  { %v23_v16 = vpop.xlane.xlu0 %22 }
  0xb7   :  { %v28_v17 = vmul.f32 0.03125, %v23_v16 }
  0xb9   :  { %v29_v18 = vmul.f32 %v28_v17, %v28_v17 }
  0xbb   :  { %v27_v19 = vpop.xlane.xlu1 %26  ;;  %v30_v20 = vmul.f32 32.0, %v29_v18 }
  0xbd   :  { %v31_v21 = vsub.f32 %v27_v19, %v30_v20 }
  0xbf   :  { %v32_v22 = vmax.f32 %v31_v21, 0.0 }
  0xc1   :  { %v33_v23 = vmul.f32 0.032258064, %v32_v22 }
  0xc3   :  { %185 = vrsqrt.f32 %v33_v23  ;;  %vm36_vm1 = vcmp.eq.f32.partialorder %v33_v23, inf  ;;  %v39_v25 = vand.u32 2147483648, %v33_v23  ;;  %vm38_vm2 = vcmp.eq.f32.partialorder %v33_v23, 0.0 }
  0xcd   :  { %v186_v24 = vpop.eup %185 }
  0xce   :  { %v35_v26 = vmul.f32 %v186_v24, %v33_v23 }
  0xd0   :  { %v37_v27 = vsel %vm36_vm1, %v33_v23, %v35_v26 }
  0xd1   :  { %v40_v28 = vsel %vm38_vm2, %v39_v25, %v37_v27 }
  0xd2   :  { %v41_v29 = vadd.f32 1e-06, %v40_v28 }
  0xd4   :  { %187 = vrcp.f32 %v41_v29 }
  0xde   :  { %v188_v30 = vpop.eup %187 }
  0xdf   :  { %v43_v31 = vmul.f32 %v188_v30, %v41_v29 }
  0xe1   :  { %v44_v32 = vsub.f32 2.0, %v43_v31 }
  0xe3   :  { %v45_v34 = vmul.f32 %v188_v30, %v44_v32 }
  0xe5   :  { %v47_v35 = vmul.f32 %v271_v33, %v45_v34 }
  0xe7   :  { %v48_v37 = vmul.f32 %v47_v35, %v28_v17  ;;  %v51_v38 = vmul.f32 %v47_v35, %v252_v0 }
  0xe9   :  { %v50_v39 = vsub.f32 %v277_v36, %v48_v37 }
  0xeb   :  { %v52_v40 = vadd.f32 %v51_v38, %v50_v39 }
  0xed   :  { %53 = vst.msk [vmem:[#allocation4] sm:$0xf] %vm20_vm0, %v52_v40 }
 0x103   :  { %v60_v41 = vpop.xlane.xlu0 %59 }
 0x104   :  { %v68_v42 = vmul.f32 0.03125, %v60_v41 }
 0x106   :  { %v69_v43 = vmul.f32 %v68_v42, %v68_v42 }
 0x107   :  { %v98_v44 = vpop.xlane.xlu1 %97  ;;  %v67_v45 = vpop.xlane.xlu0 %66 }
 0x108   :  { %v282_v46 = vmul.f32 0.03125, %v98_v44  ;;  %v70_v47 = vmul.f32 32.0, %v69_v43 }
 0x10a   :  { %v106_v48 = vmul.f32 %v282_v46, %v282_v46  ;;  %v71_v49 = vsub.f32 %v67_v45, %v70_v47 }
 0x10b   :  { %v135_v50 = vpop.xlane.xlu1 %134  ;;  %v104_v51 = vpop.xlane.xlu0 %103 }
 0x10c   :  { %v72_v52 = vmax.f32 %v71_v49, 0.0  ;;  %v286_v53 = vmul.f32 0.03125, %v135_v50  ;;  %v107_v54 = vmul.f32 32.0, %v106_v48 }
 0x10e   :  { %v73_v55 = vmul.f32 0.032258064, %v72_v52  ;;  %v143_v56 = vmul.f32 %v286_v53, %v286_v53  ;;  %v108_v57 = vsub.f32 %v104_v51, %v107_v54 }
 0x10f   :  { %v141_v58 = vpop.xlane.xlu0 %140 }
 0x110   :  { %189 = vrsqrt.f32 %v73_v55  ;;  %v144_v59 = vmul.f32 32.0, %v143_v56  ;;  %v109_v60 = vmax.f32 %v108_v57, 0.0  ;;  %vm76_vm3 = vcmp.eq.f32.partialorder %v73_v55, inf }
 0x111   :  { %v79_v4 = vand.u32 2147483648, %v73_v55  ;;  %vm78_vm4 = vcmp.eq.f32.partialorder %v73_v55, 0.0 }
 0x112   :  { %v110_v61 = vmul.f32 0.032258064, %v109_v60  ;;  %v145_v62 = vsub.f32 %v141_v58, %v144_v59 }
 0x114   :  { %191 = vrsqrt.f32 %v110_v61  ;;  %v146_v63 = vmax.f32 %v145_v62, 0.0  ;;  %vm113_vm5 = vcmp.eq.f32.partialorder %v110_v61, inf  ;;  %v116_v10 = vand.u32 2147483648, %v110_v61 }
 0x115   :  { %vm115_vm6 = vcmp.eq.f32.partialorder %v110_v61, 0.0 }
 0x116   :  { %v147_v1 = vmul.f32 0.032258064, %v146_v63 }
 0x118   :  { %193 = vrsqrt.f32 %v147_v1  ;;  %vm150_vm7 = vcmp.eq.f32.partialorder %v147_v1, inf  ;;  %v153_v16 = vand.u32 2147483648, %v147_v1  ;;  %vm152_vm8 = vcmp.eq.f32.partialorder %v147_v1, 0.0 }
 0x11a   :  { %v190_v2 = vpop.eup %189 }
 0x11b   :  { %v75_v3 = vmul.f32 %v190_v2, %v73_v55 }
 0x11d   :  { %v77_v5 = vsel %vm76_vm3, %v73_v55, %v75_v3 }
 0x11e   :  { %v80_v6 = vsel %vm78_vm4, %v79_v4, %v77_v5  ;;  %v192_v7 = vpop.eup %191 }
 0x11f   :  { %v81_v8 = vadd.f32 1e-06, %v80_v6  ;;  %v112_v9 = vmul.f32 %v192_v7, %v110_v61 }
 0x121   :  { %195 = vrcp.f32 %v81_v8  ;;  %v114_v11 = vsel %vm113_vm5, %v110_v61, %v112_v9 }
 0x122   :  { %v117_v12 = vsel %vm115_vm6, %v116_v10, %v114_v11  ;;  %v194_v13 = vpop.eup %193 }
 0x123   :  { %v118_v14 = vadd.f32 1e-06, %v117_v12  ;;  %v149_v15 = vmul.f32 %v194_v13, %v147_v1 }
 0x125   :  { %197 = vrcp.f32 %v118_v14  ;;  %v151_v17 = vsel %vm150_vm7, %v147_v1, %v149_v15 }
 0x126   :  { %v154_v18 = vsel %vm152_vm8, %v153_v16, %v151_v17 }
 0x127   :  { %v155_v19 = vadd.f32 1e-06, %v154_v18 }
 0x129   :  { %199 = vrcp.f32 %v155_v19 }
 0x12b   :  { %v196_v20 = vpop.eup %195 }
 0x12c   :  { %v83_v21 = vmul.f32 %v196_v20, %v81_v8 }
 0x12e   :  { %v84_v22 = vsub.f32 2.0, %v83_v21 }
 0x12f   :  { %v198_v23 = vpop.eup %197 }
 0x130   :  { %v85_v24 = vmul.f32 %v196_v20, %v84_v22  ;;  %v120_v25 = vmul.f32 %v198_v23, %v118_v14 }
 0x132   :  { %v86_v26 = vmul.f32 %v85_v24, %v271_v33  ;;  %v121_v27 = vsub.f32 2.0, %v120_v25 }
 0x133   :  { %v200_v29 = vpop.eup %199 }
 0x134   :  { %v87_v28 = vmul.f32 %v86_v26, %v68_v42  ;;  %v122_v30 = vmul.f32 %v198_v23, %v121_v27  ;;  %v89_v32 = vmul.f32 %v86_v26, %v252_v0  ;;  %v157_v34 = vmul.f32 %v200_v29, %v155_v19 }
 0x136   :  { %v88_v31 = vsub.f32 %v277_v36, %v87_v28  ;;  %v123_v35 = vmul.f32 %v122_v30, %v271_v33  ;;  %v158_v38 = vsub.f32 2.0, %v157_v34 }
 0x138   :  { %v90_v37 = vadd.f32 %v89_v32, %v88_v31  ;;  %v124_v39 = vmul.f32 %v123_v35, %v282_v46  ;;  %v159_v40 = vmul.f32 %v200_v29, %v158_v38  ;;  %v126_v42 = vmul.f32 %v123_v35, %v252_v0 }
 0x13a   :  { %92 = vst.msk [vmem:[#allocation4] sm:$0xf] %vm91_vm9, %v90_v37  ;;  %v125_v41 = vsub.f32 %v277_v36, %v124_v39  ;;  %v160_v43 = vmul.f32 %v159_v40, %v271_v33 }
 0x13c   :  { %v127_v44 = vadd.f32 %v126_v42, %v125_v41  ;;  %v161_v45 = vmul.f32 %v160_v43, %v286_v53  ;;  %v163_v48 = vmul.f32 %v160_v43, %v252_v0 }
 0x13e   :  { %129 = vst.msk [vmem:[#allocation4] sm:$0xf] %vm128_vm10, %v127_v44  ;;  %v162_v47 = vsub.f32 %v277_v36, %v161_v45 }
 0x140   :  { %v164_v46 = vadd.f32 %v163_v48, %v162_v47 }
 0x142   :  { %166 = vst.msk [vmem:[#allocation4] sm:$0xf] %vm165_vm11, %v164_v46 }
 0x143   :  { %212 = shalt.err (!%p209_p4)
}
 0x144   :  { %s213_s23 = scalar_lea.hbm %s316_s3, 64 }
 0x145   :  { %p214_p5 = scmp.ne.s32.totalorder %s316_s3, %s213_s23  ;;  %p217_p6 = scmp.lt.u32.totalorder %s213_s23, %s316_s3 }
 0x147   :  { %p219_p7 = pnand %p217_p6, %p214_p5 }
 0x149   :  { %222 = shalt.err (!%p219_p7)
}
 0x14a   :  { %176 = dma.vmem_to_hbm [thread:$0]  %s174_s1, 64, %s316_s3, [#allocation5]  }
 0x14b   :  { %223 = dma.done.wait [#allocation5], 64  }
 0x14c   :  { %224 = vsyncadd [#allocation5], 4294967232 }
 0x14d   :  { %180 = vsyncpa [#allocation5], 1 }

</bundles_post_ra>
